<compile_context>
chip_gen: v7x
topology: tpu7x:2x2x1
jax: 0.10.0
libtpu: 0.0.40
codegen_flags: <defaults>
</compile_context>

<pallas_src>
import jax
import jax.numpy as jnp
import numpy as np
from jax import lax
from jax.experimental import pallas as pl
from jax.experimental.pallas import tpu as pltpu


def _sender_kernel(adj_ref, x_ref, w1_ref, w2_ref, b_ref, cb_ref, cbsq_ref,
                   onehot_ref, loss_ref):
    B = onehot_ref.shape[0]
    V_pad = onehot_ref.shape[1]
    N = x_ref.shape[0]
    V, H = cb_ref.shape

    # ---- stacked one-hot gather of [target ; ego] node rows (one MXU op) ----
    node_iota = lax.broadcasted_iota(jnp.int32, (2 * B, N), 1)         # (2B, N)
    sel = (node_iota == adj_ref[...]).astype(jnp.float32)              # (2B, N)
    g = jnp.dot(sel, x_ref[...], preferred_element_type=jnp.float32)   # (2B, F)

    # ---- fused (graph-layer o fc) on the gathered rows (folded weights) ----
    out = (jnp.dot(g[:B], w1_ref[...], preferred_element_type=jnp.float32)
           + jnp.dot(g[B:], w2_ref[...], preferred_element_type=jnp.float32)
           + b_ref[...])                                               # (B, H)

    # ---- vector-quantize: nearest codebook row under squared L2 ----
    # ||out||^2 is constant per row -> argmin(||cb||^2 - 2*out.cb).
    cross = lax.dot_general(out, cb_ref[...],
                            dimension_numbers=(((1,), (1,)), ((), ())),
                            preferred_element_type=jnp.float32)        # (B, V)
    score = cbsq_ref[...] - 2.0 * cross                                # (B, V)

    min_s = jnp.min(score, axis=-1, keepdims=True)                     # (B, 1)
    v_iota = lax.broadcasted_iota(jnp.int32, (B, V), 1)
    idx_col = jnp.min(jnp.where(score <= min_s, v_iota, V),
                      axis=-1, keepdims=True)                          # (B, 1)

    # Lane-dense one-hot store (V_pad is a multiple of 128); columns >= V are 0.
    pad_iota = lax.broadcasted_iota(jnp.int32, (B, V_pad), 1)
    onehot_ref[...] = (pad_iota == idx_col).astype(jnp.float32)

    # Commitment loss from already-available terms (no quant matmul):
    #   ||out_b - cb[idx_b]||^2 = ||out_b||^2 + min_v score_b,v
    out_sq = jnp.sum(out * out, axis=-1, keepdims=True)                # (B, 1)
    dist = jnp.maximum(min_s + out_sq, 0.0)                            # (B, 1)
    loss_ref[0, 0] = 0.2 * jnp.sum(dist) / (B * H)


def fold_sender_params(w_layer, b_layer, w_fc, b_fc, codebook):
    """Weight-static preprocessing (done once per parameter update, amortized)."""
    E = w_layer.shape[1]
    H = w_fc.shape[1]
    w1 = w_layer @ w_fc[:E]                                   # (F, H)
    w2 = w_layer @ w_fc[E:]                                   # (F, H)
    b_out = (b_layer @ (w_fc[:E] + w_fc[E:]) + b_fc).reshape(1, H)
    cb_sq = jnp.sum(codebook * codebook, axis=-1)[None, :]    # (1, V)
    return w1, w2, b_out, codebook, cb_sq


def sender_forward(adj_tgt, adj_ego, x, w1, w2, b_out, codebook, cb_sq):
    """Fused Sender forward: one-hot message (B, V) f32 and commitment loss."""
    B = adj_tgt.shape[0]
    V, _ = codebook.shape
    V_pad = ((V + 127) // 128) * 128

    adj = jnp.concatenate([adj_tgt, adj_ego]).reshape(2 * B, 1).astype(jnp.int32)

    onehot_pad, loss = pl.pallas_call(
        _sender_kernel,
        out_shape=(jax.ShapeDtypeStruct((B, V_pad), jnp.float32),
                   jax.ShapeDtypeStruct((1, 1), jnp.float32)),
        in_specs=[pl.BlockSpec(memory_space=pltpu.MemorySpace.VMEM)] * 7,
        out_specs=(pl.BlockSpec(memory_space=pltpu.MemorySpace.VMEM),
                   pl.BlockSpec(memory_space=pltpu.MemorySpace.SMEM)),
    )(adj, x, w1, w2, b_out, codebook, cb_sq)
    return onehot_pad[:, :V], loss[0, 0]


if __name__ == "__main__":
    B = 4            # graphs per batch
    nodes = 6        # nodes per graph
    N = B * nodes    # total nodes
    F = 8            # num_node_features
    E = 32           # embedding_size
    H = 32           # hidden_size
    V = 16           # vocab_size

    key = jax.random.PRNGKey(0)
    ks = jax.random.split(key, 8)
    x = jax.random.normal(ks[0], (N, F), jnp.float32)
    w_layer = jax.random.normal(ks[1], (F, E), jnp.float32) * 0.1
    b_layer = jax.random.normal(ks[2], (E,), jnp.float32) * 0.1
    w_fc = jax.random.normal(ks[3], (2 * E, H), jnp.float32) * 0.1
    b_fc = jax.random.normal(ks[4], (H,), jnp.float32) * 0.1
    codebook = jax.random.normal(ks[5], (V, H), jnp.float32)

    batch_ptr = jnp.arange(B + 1, dtype=jnp.int32) * nodes
    target_node_idx = jax.random.randint(ks[6], (B,), 0, nodes, jnp.int32)
    ego_node_idx = jax.random.randint(ks[7], (B,), 0, nodes, jnp.int32)

    # adjusted indices = per-graph index + graph offset (as in forward()).
    adj_tgt = target_node_idx + batch_ptr[:-1]
    adj_ego = ego_node_idx + batch_ptr[:-1]

    # weight-static fold (amortized across calls).
    w1, w2, b_out, cb, cb_sq = fold_sender_params(w_layer, b_layer, w_fc,
                                                  b_fc, codebook)

    onehot, commit_loss = sender_forward(adj_tgt, adj_ego, x,
                                         w1, w2, b_out, cb, cb_sq)
    jax.block_until_ready((onehot, commit_loss))

    # Pure-JAX reference check (un-folded, matches the PyTorch forward).
    h_ref = x @ w_layer + b_layer
    cat_ref = jnp.concatenate([h_ref[adj_tgt], h_ref[adj_ego]], axis=1)
    out_ref = cat_ref @ w_fc + b_fc
    d_ref = jnp.sum((out_ref[:, None, :] - codebook[None, :, :]) ** 2, axis=-1)
    idx_ref = jnp.argmin(d_ref, axis=-1)
    onehot_ref = jax.nn.one_hot(idx_ref, V, dtype=jnp.float32)
    loss_ref = 0.2 * jnp.mean((out_ref - codebook[idx_ref]) ** 2)

    idx_from_kernel = jnp.argmax(onehot, axis=-1)
    assert np.array_equal(np.asarray(idx_from_kernel), np.asarray(idx_ref))
    assert np.allclose(np.asarray(onehot), np.asarray(onehot_ref))
    assert np.allclose(float(commit_loss), float(loss_ref), rtol=1e-4, atol=1e-5)
    print("KERNEL_OK")
</pallas_src>

<mosaic_0001>
module attributes {stable_mosaic.version = 11 : i64} {
  func.func @_sender_kernel(%arg0: memref<8x1xi32, #tpu.memory_space<vmem>>, %arg1: memref<24x8xf32, #tpu.memory_space<vmem>>, %arg2: memref<8x32xf32, #tpu.memory_space<vmem>>, %arg3: memref<8x32xf32, #tpu.memory_space<vmem>>, %arg4: memref<1x32xf32, #tpu.memory_space<vmem>>, %arg5: memref<16x32xf32, #tpu.memory_space<vmem>>, %arg6: memref<1x16xf32, #tpu.memory_space<vmem>>, %arg7: memref<4x128xf32, #tpu.memory_space<vmem>>, %arg8: memref<1x1xf32, #tpu.memory_space<smem>>) attributes {dimension_semantics = [], scalar_prefetch = 0 : i64, scratch_operands = 0 : i64, tpu.core_type = #tpu.core_type<tc>} {
    %0 = tpu.iota {dimensions = array<i32: 1>} : vector<8x24xi32>
    %c0 = arith.constant 0 : index
    %c0_0 = arith.constant 0 : index
    %1 = vector.load %arg0[%c0, %c0_0] : memref<8x1xi32, #tpu.memory_space<vmem>>, vector<8x1xi32>
    %2 = vector.broadcast %1 : vector<8x1xi32> to vector<8x24xi32>
    %3 = arith.cmpi eq, %0, %2 : vector<8x24xi32>
    %4 = arith.extui %3 : vector<8x24xi1> to vector<8x24xi32>
    %5 = arith.sitofp %4 : vector<8x24xi32> to vector<8x24xf32>
    %c0_1 = arith.constant 0 : index
    %c0_2 = arith.constant 0 : index
    %6 = vector.load %arg1[%c0_1, %c0_2] : memref<24x8xf32, #tpu.memory_space<vmem>>, vector<24x8xf32>
    %cst = arith.constant dense<0.000000e+00> : vector<8x8xf32>
    %7 = tpu.matmul %5, %6, %cst {dimension_numbers = #tpu.dot_dimension_numbers<[1], [0], [0], [1], [0, 0, 1, 1], [], []>} : vector<8x24xf32>, vector<24x8xf32>, vector<8x8xf32> -> vector<8x8xf32>
    %8 = vector.extract_strided_slice %7 {offsets = [0, 0], sizes = [4, 8], strides = [1, 1]} : vector<8x8xf32> to vector<4x8xf32>
    %c0_3 = arith.constant 0 : index
    %c0_4 = arith.constant 0 : index
    %9 = vector.load %arg2[%c0_3, %c0_4] : memref<8x32xf32, #tpu.memory_space<vmem>>, vector<8x32xf32>
    %cst_5 = arith.constant dense<0.000000e+00> : vector<4x32xf32>
    %10 = tpu.matmul %8, %9, %cst_5 {dimension_numbers = #tpu.dot_dimension_numbers<[1], [0], [0], [1], [0, 0, 1, 1], [], []>} : vector<4x8xf32>, vector<8x32xf32>, vector<4x32xf32> -> vector<4x32xf32>
    %11 = vector.extract_strided_slice %7 {offsets = [4, 0], sizes = [4, 8], strides = [1, 1]} : vector<8x8xf32> to vector<4x8xf32>
    %c0_6 = arith.constant 0 : index
    %c0_7 = arith.constant 0 : index
    %12 = vector.load %arg3[%c0_6, %c0_7] : memref<8x32xf32, #tpu.memory_space<vmem>>, vector<8x32xf32>
    %cst_8 = arith.constant dense<0.000000e+00> : vector<4x32xf32>
    %13 = tpu.matmul %11, %12, %cst_8 {dimension_numbers = #tpu.dot_dimension_numbers<[1], [0], [0], [1], [0, 0, 1, 1], [], []>} : vector<4x8xf32>, vector<8x32xf32>, vector<4x32xf32> -> vector<4x32xf32>
    %14 = arith.addf %10, %13 : vector<4x32xf32>
    %c0_9 = arith.constant 0 : index
    %c0_10 = arith.constant 0 : index
    %15 = vector.load %arg4[%c0_9, %c0_10] : memref<1x32xf32, #tpu.memory_space<vmem>>, vector<1x32xf32>
    %16 = vector.broadcast %15 : vector<1x32xf32> to vector<4x32xf32>
    %17 = arith.addf %14, %16 : vector<4x32xf32>
    %c0_11 = arith.constant 0 : index
    %c0_12 = arith.constant 0 : index
    %18 = vector.load %arg5[%c0_11, %c0_12] : memref<16x32xf32, #tpu.memory_space<vmem>>, vector<16x32xf32>
    %cst_13 = arith.constant dense<0.000000e+00> : vector<4x16xf32>
    %19 = tpu.matmul %17, %18, %cst_13 {dimension_numbers = #tpu.dot_dimension_numbers<[1], [1], [0], [0], [0, 0, 1, 0], [], []>} : vector<4x32xf32>, vector<16x32xf32>, vector<4x16xf32> -> vector<4x16xf32>
    %c0_14 = arith.constant 0 : index
    %c0_15 = arith.constant 0 : index
    %20 = vector.load %arg6[%c0_14, %c0_15] : memref<1x16xf32, #tpu.memory_space<vmem>>, vector<1x16xf32>
    %cst_16 = arith.constant 2.000000e+00 : f32
    %21 = vector.broadcast %cst_16 : f32 to vector<4x16xf32>
    %22 = arith.mulf %21, %19 : vector<4x16xf32>
    %23 = vector.broadcast %20 : vector<1x16xf32> to vector<4x16xf32>
    %24 = arith.subf %23, %22 : vector<4x16xf32>
    %cst_17 = arith.constant dense<0x7F800000> : vector<4xf32>
    %25 = vector.multi_reduction <minimumf>, %24, %cst_17 [1] : vector<4x16xf32> to vector<4xf32>
    %26 = vector.shape_cast %25 : vector<4xf32> to vector<4x1xf32>
    %27 = tpu.iota {dimensions = array<i32: 1>} : vector<4x16xi32>
    %28 = vector.broadcast %26 : vector<4x1xf32> to vector<4x16xf32>
    %29 = arith.cmpf ole, %24, %28 : vector<4x16xf32>
    %c16_i32 = arith.constant 16 : i32
    %30 = vector.broadcast %c16_i32 : i32 to vector<4x16xi32>
    %31 = arith.select %29, %27, %30 : vector<4x16xi1>, vector<4x16xi32>
    %cst_18 = arith.constant dense<2147483647> : vector<4xi32>
    %32 = vector.multi_reduction <minsi>, %31, %cst_18 [1] : vector<4x16xi32> to vector<4xi32>
    %33 = vector.shape_cast %32 : vector<4xi32> to vector<4x1xi32>
    %34 = tpu.iota {dimensions = array<i32: 1>} : vector<4x128xi32>
    %35 = vector.broadcast %33 : vector<4x1xi32> to vector<4x128xi32>
    %36 = arith.cmpi eq, %34, %35 : vector<4x128xi32>
    %37 = arith.extui %36 : vector<4x128xi1> to vector<4x128xi32>
    %38 = arith.sitofp %37 : vector<4x128xi32> to vector<4x128xf32>
    %c0_19 = arith.constant 0 : index
    %c0_20 = arith.constant 0 : index
    %39 = vector.load %arg7[%c0_19, %c0_20] : memref<4x128xf32, #tpu.memory_space<vmem>>, vector<4x128xf32>
    tpu.vector_store %arg7[%c0_19, %c0_20], %38 {strides = array<i32>} : memref<4x128xf32, #tpu.memory_space<vmem>>, vector<4x128xf32>,
    %40 = arith.mulf %17, %17 : vector<4x32xf32>
    %cst_21 = arith.constant dense<0.000000e+00> : vector<4xf32>
    %41 = vector.multi_reduction <add>, %40, %cst_21 [1] : vector<4x32xf32> to vector<4xf32>
    %42 = vector.shape_cast %41 : vector<4xf32> to vector<4x1xf32>
    %43 = arith.addf %26, %42 : vector<4x1xf32>
    %cst_22 = arith.constant 0.000000e+00 : f32
    %44 = vector.broadcast %cst_22 : f32 to vector<4x1xf32>
    %45 = arith.maximumf %43, %44 : vector<4x1xf32>
    %46 = vector.shape_cast %45 : vector<4x1xf32> to vector<1x4x1xf32>
    %cst_23 = arith.constant dense<0.000000e+00> : vector<1xf32>
    %47 = vector.multi_reduction <add>, %46, %cst_23 [1, 2] : vector<1x4x1xf32> to vector<1xf32>
    %48 = vector.shape_cast %47 : vector<1xf32> to vector<1x1x1xf32>
    %49 = vector.extract %48[0, 0, 0] : f32 from vector<1x1x1xf32>
    %cst_24 = arith.constant 2.000000e-01 : f32
    %50 = arith.mulf %cst_24, %49 : f32
    %cst_25 = arith.constant 1.280000e+02 : f32
    %51 = arith.divf %50, %cst_25 : f32
    %c0_26 = arith.constant 0 : index
    %c0_27 = arith.constant 0 : index
    %52 = memref.load %arg8[%c0_26, %c0_27] : memref<1x1xf32, #tpu.memory_space<smem>>
    memref.store %51, %arg8[%c0_26, %c0_27] : memref<1x1xf32, #tpu.memory_space<smem>>
    return
  }
}

</mosaic_0001>

<bundles_post_ra>
// kernel: tpu_custom_call.1
= control target key start
LH: loop header
LB: loop body
LE: loop exit
PB: predicated region body
PF: predicated region fallthrough
CT: control target
= control target key end

     0   :  { %14 = vsyncpa [#allocation3], 0  ;;  %v539_v3 = vmov 0   ;;  %v540_v4 = vmov 0.0|0.0   ;;  %s662_s0 = inlined_call_operand.vmem [shape: s32[8,1], index: 0, kind: input, shape index: {}]   ;;  %s663_s1 = inlined_call_operand.vmem [shape: f32[24,8], index: 1, kind: input, shape index: {}]   ;;  %s664_s2 = inlined_call_operand.vmem [shape: f32[8,32], index: 2, kind: input, shape index: {}]   ;;  %s665_s3 = inlined_call_operand.vmem [shape: f32[8,32], index: 3, kind: input, shape index: {}]   ;;  %s666_s4 = inlined_call_operand.vmem [shape: f32[1,32], index: 4, kind: input, shape index: {}]   ;;  %s667_s5 = inlined_call_operand.vmem [shape: f32[16,32], index: 5, kind: input, shape index: {}]   ;;  %s668_s6 = inlined_call_operand.vmem [shape: f32[1,16], index: 6, kind: input, shape index: {}]   ;;  %s669_s7 = inlined_call_operand.hbm [shape: f32[4,128], index: 7, kind: output, shape index: {0}]   ;;  %s670_s8 = inlined_call_operand.hbm [shape: f32[1,1], index: 8, kind: output, shape index: {1}]  }
   0x1   :  { %v32_v0 = vld [vmem:[%s662_s0] sm:$0xff]  ;;  %v40_v2 = vld [vmem:[%s663_s1 + $0x8] sm:$0xff]  ;;  %502 = vset.pattern.permute.xlu0 %v539_v3  ;;  %487 = vmatprep.subr.bf16.mxu0 %v540_v4 }
   0x2   :  { %v39_v1 = vld [vmem:[%s663_s1] sm:$0xff] }
   0x3   :  { %v488_v5 = vpack.c.bf16 %v40_v2, %v39_v1 }
   0x4   :  { %15 = vsyncpa [#allocation4], 0  ;;  %34 = vperm.xlu0 %502, %v32_v0   ;;  %v541_v6 = vmov 0.0   ;;  %vm542_vm0 = vmmov 0   ;;  %v41_v7 = vld [vmem:[%s663_s1 + $0x10] sm:$0xff]  ;;  %v30_v8 = vlaneseq  ;;  %vm42_vm1 = vcmask 195584  }
   0x5   :  { %470 = vmatprep.subr.mxu1 %v541_v6  ;;  %489 = vmatpush3.bf16.msra.mxu0 %v488_v5  ;;  %v117_v12 = vld [vmem:[%s665_s3] sm:$0xff]  ;;  %vm120_vm3 = vcmask 64512   ;;  %v274_v18 = vld [vmem:[%s667_s5 + $0x8] sm:$0xff]  ;;  %vm275_vm4 = vcmask 261120   ;;  %vm390_vm6 = vcmask 257024   ;;  %vm364_vm7 = vcmask 125952  }
   0x6   :  { %467 = vmatprep.mubr.msk.f32.mxu0 %vm542_vm0, %v541_v6  ;;  %465 = vmatprep.subr.mxu0 %v541_v6  ;;  %v608_v9 = vand.u32 127, %v30_v8  ;;  %v116_v16 = vld [vmem:[%s664_s2] sm:$0xff]  ;;  %vm492_vm5 = vmpackc.low %vm275_vm4, %vm275_vm4  ;;  %vm396_vm9 = vcmask 3072   ;;  %s503_s23 = scalar_lea.hbm %s670_s8, 16 }
   0x7   :  { %472 = vmatprep.mubr.msk.f32.mxu1 %vm542_vm0, %v541_v6  ;;  %471 = vmatpush3.msra.mxu1 %v117_v12  ;;  %v273_v17 = vld [vmem:[%s667_s5] sm:$0xff]  ;;  %p504_p0 = scmp.ne.s32.totalorder %s670_s8, %s503_s23  ;;  %p507_p1 = scmp.lt.u32.totalorder %s503_s23, %s670_s8 }
   0x8   :  { %475 = vmatprep.subr.mxu1 %v541_v6  ;;  %v491_v19 = vpack.c.bf16 %v274_v18, %v273_v17  ;;  %v444_v23 = vld [vmem:[%s666_s4] ss:$0 sm:$0xff] }
   0x9   :  { %466 = vmatpush3.msra.mxu0 %v41_v7  ;;  %v448_v30 = vld [vmem:[%s668_s6] ss:$0 sm:$0xff]  ;;  %p509_p2 = pnand %p507_p1, %p504_p0 }
   0xa   :  { %490 = vmatprep.subr.bf16.mxu0 %v540_v4 }
  0x83   :  { %v35_v10 = vpop.permute.xlu0 %34 }
  0x84   :  { %vm36_vm2 = vcmp.eq.s32.totalorder %v608_v9, %v35_v10 }
  0x85   :  { %v440_v11 = vsel %vm36_vm2, 1.0, %v541_v6 }
  0x86   :  { %468 = vmatmul.mubr.msk.f32.vlgmr.msra.gmra.mrb[0].mxu0 %vm42_vm1, %v440_v11 }
  0x87   :  { %484 = vmatprep.mubr.msk.f32.mxu0 %vm542_vm0, %v541_v6  ;;  %493 = vmatpush3.bf16.xpose.msk.msra.mxu0 %vm492_vm5, %v491_v19 }
 0x159   :  { %v112_v13 = vpop.f32.mrb[0].mxu0 }
 0x15a   :  { %v119_v14 = vrot.slane %v112_v13, 4  ;;  %v469_v15 = vpop.f32.mrb[1].mxu0 }
 0x15c   :  { %473 = vmatmul.mubr.msk.f32.vlgmr.msra.gmra.mrb[0].mxu1 %vm120_vm3, %v119_v14 }
 0x15d   :  { %476 = vmatpush3.msra.mxu1 %v116_v16  ;;  %477 = vmatprep.mubr.msk.f32.mxu1 %vm542_vm0, %v541_v6 }
 0x160   :  { %478 = vmatmul.mubr.msk.f32.vlgmr.msra.gmra.mrb[2].mxu1 %vm120_vm3, %v112_v13 }
 0x22f   :  { %v189_v20 = vpop.f32.mrb[0].mxu1 }
 0x230   :  { %v474_v21 = vpop.f32.mrb[1].mxu1 }
 0x233   :  { %v261_v22 = vpop.f32.mrb[2].mxu1 }
 0x234   :  { %v262_v24 = vadd.f32 %v261_v22, %v189_v20  ;;  %v479_v25 = vpop.f32.mrb[3].mxu1 }
 0x236   :  { %v272_v26 = vadd.f32 %v444_v23, %v262_v24 }
 0x238   :  { %485 = vmatmul.mubr.msk.f32.vlgmr.msra.gmra.mrb[2].mxu0 %vm275_vm4, %v272_v26  ;;  %v389_v27 = vmul.f32 %v272_v26, %v272_v26 }
 0x23a   :  { %v391_v28 = vsel %vm390_vm6, %v389_v27, 0.0 }
 0x23b   :  { %392 = vadd.xlane.f32.xlu1 %v391_v28 }
 0x2c8   :  { %v393_v36 = vpop.xlane.xlu1 %392 }
 0x30b   :  { %v351_v29 = vpop.f32.mrb[2].mxu0 }
 0x30c   :  { %v356_v31 = vmul.f32 2.0, %v351_v29  ;;  %v486_v32 = vpop.f32.mrb[3].mxu0 }
 0x30e   :  { %v363_v33 = vsub.f32 %v448_v30, %v356_v31 }
 0x310   :  { %v365_v34 = vsel %vm364_vm7, %v363_v33, inf }
 0x311   :  { %366 = vmin.xlane.f32.xlu0 %v365_v34 }
 0x39e   :  { %v367_v35 = vpop.xlane.xlu0 %366 }
 0x39f   :  { %vm368_vm8 = vcmp.le.f32.partialorder %v363_v33, %v367_v35  ;;  %v394_v39 = vadd.f32 %v393_v36, %v367_v35 }
 0x3a0   :  { %v369_v37 = vsel %vm368_vm8, %v608_v9, 16 }
 0x3a1   :  { %v370_v38 = vsel %vm364_vm7, %v369_v37, 2147483647  ;;  %v395_v42 = vmax.f32 %v394_v39, 0.0 }
 0x3a2   :  { %v372_v40 = vshra.s32 %v370_v38, 16  ;;  %v371_v44 = vand.u32 65535, %v370_v38 }
 0x3a3   :  { %v397_v43 = vsel %vm396_vm9, %v395_v42, 0.0 }
 0x3a4   :  { %v374_v41 = vcvt.s32.f32 %v372_v40  ;;  %v373_v46 = vcvt.s32.f32 %v371_v44 }
 0x3a6   :  { %375 = vmin.xlane.f32.xlu1 %v374_v41 }
 0x3aa   :  { %398 = vadd.xlane.f32.xlu1 %v397_v43 }
 0x433   :  { %v376_v45 = vpop.xlane.xlu1 %375 }
 0x434   :  { %vm377_vm10 = vcmp.eq.f32.partialorder %v374_v41, %v376_v45 }
 0x435   :  { %v378_v47 = vsel %vm377_vm10, %v373_v46, inf }
 0x436   :  { %379 = vmin.xlane.f32.xlu1 %v378_v47 }
 0x437   :  { %v399_v48 = vpop.xlane.xlu1 %398 }
 0x438   :  { %v400_v49 = vrot.slane %v399_v48, 4 }
 0x43a   :  { %v401_v50 = vadd.f32 %v400_v49, %v399_v48 }
 0x43c   :  { %v402_v51 = vrot.slane %v401_v50, 2 }
 0x43e   :  { %v403_v52 = vadd.f32 %v402_v51, %v401_v50 }
 0x440   :  { %v404_v53 = vrot.slane %v403_v52, 1 }
 0x442   :  { %v405_v54 = vadd.f32 %v404_v53, %v403_v52 }
 0x444   :  { %494 = vpush %v405_v54 }
 0x475   :  { %s495_s4 = spop %494 }
 0x476   :  { %s407_s6 = smul.f32 0.2, %s495_s4 }
 0x478   :  { %s410_s20 = smul.f32 0.0078125, %s407_s6 }
 0x47a   :  { %412 = sst [smem:[#allocation5]] %s410_s20 }
 0x47b   :  { %512 = shalt.err (!%p509_p2)
}
 0x47c   :  { %s543_s28 = smov [#allocation5]   ;;  %v382_v55 = vcvt.f32.s32 %v376_v45  ;;  %s544_s9 = smov [#allocation2]  }
 0x47d   :  { %430 = dma.smem_to_hbm %s543_s28, 16, %s670_s8, [#allocation4]  }
 0x47e   :  { %v383_v57 = vshll.u32 %v382_v55, 16  ;;  %s419_s10 = sshll.u32 %s544_s9, 4  ;;  %s420_s10 = int_to_ptr.vmem [resolvable:$true] %s419_s10 }
 0x47f   :  { %s513_s0 = scalar_lea.vmem %s420_s10, 64  ;;  %p518_p4 = scmp.lt.s32.totalorder %s420_s10, %s420_s10 }
 0x480   :  { %p514_p3 = scmp.ne.s32.totalorder %s420_s10, %s513_s0  ;;  %p519_p5 = scmp.lt.s32.totalorder %s513_s0, %s513_s0 }
 0x482   :  { %p520_p6 = por %p519_p5, %p518_p4 }
 0x484   :  { %p521_p7 = pnand %p520_p6, %p514_p3 }
 0x4c3   :  { %v380_v56 = vpop.xlane.xlu1 %379 }
 0x4c4   :  { %v381_v58 = vcvt.f32.s32 %v380_v56 }
 0x4c6   :  { %v384_v59 = vadd.s32 %v383_v57, %v381_v58 }
 0x4c8   :  { %vm385_vm11 = vcmp.eq.s32.totalorder %v608_v9, %v384_v59 }
 0x4c9   :  { %v449_v60 = vsel %vm385_vm11, 1.0, %v541_v6 }
 0x4ca   :  { %388 = vst [vmem:[#allocation2] sm:$0xf] %v449_v60 }
 0x4cb   :  { %524 = shalt.err (!%p521_p7)
}
 0x4cc   :  { %s525_s12 = scalar_lea.hbm %s669_s7, 64 }
 0x4cd   :  { %p526_p8 = scmp.ne.s32.totalorder %s669_s7, %s525_s12  ;;  %p529_p9 = scmp.lt.u32.totalorder %s525_s12, %s669_s7 }
 0x4cf   :  { %p531_p10 = pnand %p529_p9, %p526_p8 }
 0x4d1   :  { %534 = shalt.err (!%p531_p10)
}
 0x4d2   :  { %422 = dma.vmem_to_hbm [thread:$0]  %s420_s10, 64, %s669_s7, [#allocation3]  }
 0x4d3   :  { %535 = dma.done.wait [#allocation3], 64  }
 0x4d4   :  { %536 = vsyncadd [#allocation3], 4294967232 }
 0x4d5   :  { %537 = dma.done.wait [#allocation4], 16  }
 0x4d6   :  { %538 = vsyncadd [#allocation4], 4294967280 }
 0x4d7   :  { %437 = sfence }
 0x4d8   :  { %438 = vsyncpa [#allocation3], 1 }
 0x4d9   :  { %439 = vsyncpa [#allocation4], 1 }

</bundles_post_ra>
